<compile_context>
chip_gen: v7x
topology: tpu7x:2x2x1
jax: 0.10.0
libtpu: 0.0.40
codegen_flags: <defaults>
</compile_context>

<pallas_src>
import functools
import math

import jax
import jax.numpy as jnp
from jax.experimental import pallas as pl
from jax.experimental.pallas import tpu as pltpu


_LANE = 128  # TPU vreg lane width; batch tile is a multiple of this.


def _phi_mlp_kernel(xT_ref,
                    w0_ref, w1_ref, w2_ref, w3_ref,
                    b012_ref, b3_ref,
                    o_ref, *, compute_dtype):
    """Full phi MLP hot path in VMEM, feature-major: h is (features, TB).

    4 MXU matmuls (f32 accumulation via preferred_element_type) + 3 VPU ReLUs.
    Bias add / ReLU stay in f32 even when matmul operands are bf16.
    """
    h = xT_ref[...]                                   # (input_size, TB), compute_dtype

    h = jnp.dot(w0_ref[...], h, preferred_element_type=jnp.float32)      # (64, TB) f32
    h = jnp.maximum(h + b012_ref[:, 0:1], 0.0)

    h = jnp.dot(w1_ref[...], h.astype(compute_dtype),
                preferred_element_type=jnp.float32)                       # (64, TB) f32
    h = jnp.maximum(h + b012_ref[:, 1:2], 0.0)

    h = jnp.dot(w2_ref[...], h.astype(compute_dtype),
                preferred_element_type=jnp.float32)                       # (64, TB) f32
    h = jnp.maximum(h + b012_ref[:, 2:3], 0.0)

    h = jnp.dot(w3_ref[...], h.astype(compute_dtype),
                preferred_element_type=jnp.float32)                       # (latent, TB) f32
    h = h + b3_ref[...]

    o_ref[...] = h.astype(o_ref.dtype)                # lane-dense (TB multiple of 128)


def arnold_liouville_forward(x, params, latent_size, *,
                             compute_dtype=jnp.float32, tb=None):
    """phi(x) via one Pallas kernel, reshaped to (B, latent//2, 2)."""
    B, input_size = x.shape
    (w0, b0), (w1, b1), (w2, b2), (w3, b3) = params   # PyTorch layout: W (out,in), b (out,)
    hidden = w0.shape[0]

    # ---- batch padding: always present a lane-dense batch axis -------------------
    B_pad = ((B + _LANE - 1) // _LANE) * _LANE
    if tb is None:
        tb = min(256, B_pad)
    grid = (pl.cdiv(B_pad, tb),)

    # ---- feature-major operands ---------------------------------------------------
    xT = x.T.astype(compute_dtype)                    # (input_size, B)
    if B_pad != B:
        xT = jnp.pad(xT, ((0, 0), (0, B_pad - B)))    # zero-pad batch on the lane axis
    w0c = w0.astype(compute_dtype)
    w1c = w1.astype(compute_dtype)
    w2c = w2.astype(compute_dtype)
    w3c = w3.astype(compute_dtype)
    b012 = jnp.stack([b0, b1, b2], axis=1).astype(jnp.float32)   # (hidden, 3)
    b3c = b3.reshape(latent_size, 1).astype(jnp.float32)         # (latent, 1)

    def resident(a):
        # Weights / biases: constant block index -> stay VMEM-resident across the grid.
        return pl.BlockSpec(a.shape, lambda i: (0,) * a.ndim)

    flops = 2 * B_pad * (input_size * hidden + 2 * hidden * hidden + hidden * latent_size)
    bytes_accessed = (
        xT.size * xT.dtype.itemsize
        + sum(w.size * w.dtype.itemsize for w in (w0c, w1c, w2c, w3c))
        + (b012.size + b3c.size) * 4
        + B_pad * latent_size * 4)

    zT = pl.pallas_call(
        functools.partial(_phi_mlp_kernel, compute_dtype=compute_dtype),
        out_shape=jax.ShapeDtypeStruct((latent_size, B_pad), jnp.float32),
        grid_spec=pltpu.PrefetchScalarGridSpec(
            num_scalar_prefetch=0,
            grid=grid,
            in_specs=[pl.BlockSpec((input_size, tb), lambda i: (0, i)),   # x tile moves
                      resident(w0c), resident(w1c), resident(w2c), resident(w3c),
                      resident(b012), resident(b3c)],
            out_specs=pl.BlockSpec((latent_size, tb), lambda i: (0, i)),
        ),
        compiler_params=pltpu.CompilerParams(
            dimension_semantics=("parallel",)),          # megacore split on v7x
        cost_estimate=pl.CostEstimate(flops=flops, transcendentals=0,
                                      bytes_accessed=bytes_accessed),
    )(xT, w0c, w1c, w2c, w3c, b012, b3c)

    # Glue: (latent, B_pad) -> (B, latent) -> view(B, latent//2, 2)
    z = zT[:, :B].T
    return z.reshape(B, latent_size // 2, 2)


def init_phi_params(key, input_size, latent_size, hidden=64):
    """Deterministic init matching PyTorch nn.Linear: W (out,in), b (out,), U(+-1/sqrt(fan_in))."""
    dims = [(input_size, hidden), (hidden, hidden), (hidden, hidden), (hidden, latent_size)]
    params = []
    for fan_in, fan_out in dims:
        key, kw, kb = jax.random.split(key, 3)
        bound = 1.0 / math.sqrt(fan_in)
        w = jax.random.uniform(kw, (fan_out, fan_in), jnp.float32, -bound, bound)
        b = jax.random.uniform(kb, (fan_out,), jnp.float32, -bound, bound)
        params.append((w, b))
    return params


def _reference_forward(x, params, latent_size):
    """Plain-JAX reference of the same forward, for a sanity check."""
    h = x
    n = len(params)
    for i, (w, b) in enumerate(params):
        h = h @ w.T + b
        if i < n - 1:
            h = jnp.maximum(h, 0.0)
    return h.reshape(x.shape[0], latent_size // 2, 2)


if __name__ == "__main__":
    key = jax.random.PRNGKey(0)

    input_size = 16
    latent_size = 8       # must be even (latent_size % 2 == 0)

    key, kp = jax.random.split(key)
    params = init_phi_params(kp, input_size, latent_size)

    # --- small / ragged batch (exercises the pad-to-lane path) -------------------
    B_small = 8
    key, kx = jax.random.split(key)
    x_small = jax.random.normal(kx, (B_small, input_size), jnp.float32)
    z_small = jax.block_until_ready(
        arnold_liouville_forward(x_small, params, latent_size))
    assert z_small.shape == (B_small, latent_size // 2, 2)
    assert jnp.allclose(z_small, _reference_forward(x_small, params, latent_size),
                        atol=1e-5, rtol=1e-5)

    # --- lane-dense multi-tile batch (grid of 2 with TB=128) ---------------------
    B = 256
    key, kx = jax.random.split(key)
    x = jax.random.normal(kx, (B, input_size), jnp.float32)
    z_ref = _reference_forward(x, params, latent_size)

    z = jax.block_until_ready(
        arnold_liouville_forward(x, params, latent_size, tb=128))
    assert z.shape == (B, latent_size // 2, 2)
    assert jnp.allclose(z, z_ref, atol=1e-5, rtol=1e-5)

    # bf16-matmul path (MXU fast path on v6e/v7x; f32 bias-add/ReLU preserved).
    z_bf = jax.block_until_ready(
        arnold_liouville_forward(x, params, latent_size, compute_dtype=jnp.bfloat16))
    assert z_bf.shape == (B, latent_size // 2, 2)
    assert bool(jnp.all(jnp.isfinite(z_bf)))
    rel_err = jnp.max(jnp.abs(z_bf - z_ref)) / (jnp.max(jnp.abs(z_ref)) + 1e-6)
    assert float(rel_err) < 0.1

    print("KERNEL_OK")
</pallas_src>

<mosaic_0001>
module attributes {stable_mosaic.version = 11 : i64} {
  func.func @_phi_mlp_kernel(%arg0: i32, %arg1: memref<16x128xf32, #tpu.memory_space<vmem>>, %arg2: memref<64x16xf32, #tpu.memory_space<vmem>>, %arg3: memref<64x64xf32, #tpu.memory_space<vmem>>, %arg4: memref<64x64xf32, #tpu.memory_space<vmem>>, %arg5: memref<8x64xf32, #tpu.memory_space<vmem>>, %arg6: memref<64x3xf32, #tpu.memory_space<vmem>>, %arg7: memref<8x1xf32, #tpu.memory_space<vmem>>, %arg8: memref<8x128xf32, #tpu.memory_space<vmem>>) attributes {dimension_semantics = [#tpu.dimension_semantics<parallel>], iteration_bounds = array<i64: 1>, scalar_prefetch = 0 : i64, scratch_operands = 0 : i64, tpu.core_type = #tpu.core_type<tc>, window_params = [{transform_indices = @transform_0, window_bounds = array<i64: 16, 128>}, {pipeline_mode = #tpu.pipeline_mode<synchronous>, transform_indices = @transform_1, window_bounds = array<i64: 64, 16>}, {pipeline_mode = #tpu.pipeline_mode<synchronous>, transform_indices = @transform_2, window_bounds = array<i64: 64, 64>}, {pipeline_mode = #tpu.pipeline_mode<synchronous>, transform_indices = @transform_3, window_bounds = array<i64: 64, 64>}, {pipeline_mode = #tpu.pipeline_mode<synchronous>, transform_indices = @transform_4, window_bounds = array<i64: 8, 64>}, {pipeline_mode = #tpu.pipeline_mode<synchronous>, transform_indices = @transform_5, window_bounds = array<i64: 64, 3>}, {pipeline_mode = #tpu.pipeline_mode<synchronous>, transform_indices = @transform_6, window_bounds = array<i64: 8, 1>}, {transform_indices = @transform_7, window_bounds = array<i64: 8, 128>}]} {
    %c0 = arith.constant 0 : index
    %c0_0 = arith.constant 0 : index
    %0 = vector.load %arg1[%c0, %c0_0] : memref<16x128xf32, #tpu.memory_space<vmem>>, vector<16x128xf32>
    %c0_1 = arith.constant 0 : index
    %c0_2 = arith.constant 0 : index
    %1 = vector.load %arg2[%c0_1, %c0_2] : memref<64x16xf32, #tpu.memory_space<vmem>>, vector<64x16xf32>
    %cst = arith.constant dense<0.000000e+00> : vector<64x128xf32>
    %2 = tpu.matmul %1, %0, %cst {dimension_numbers = #tpu.dot_dimension_numbers<[1], [0], [0], [1], [0, 0, 1, 1], [], []>} : vector<64x16xf32>, vector<16x128xf32>, vector<64x128xf32> -> vector<64x128xf32>
    %c0_3 = arith.constant 0 : index
    %c0_4 = arith.constant 0 : index
    %3 = vector.load %arg6[%c0_3, %c0_4] : memref<64x3xf32, #tpu.memory_space<vmem>>, vector<64x1xf32>
    %4 = vector.broadcast %3 : vector<64x1xf32> to vector<64x128xf32>
    %5 = arith.addf %2, %4 : vector<64x128xf32>
    %cst_5 = arith.constant 0.000000e+00 : f32
    %6 = vector.broadcast %cst_5 : f32 to vector<64x128xf32>
    %7 = arith.maximumf %5, %6 : vector<64x128xf32>
    %c0_6 = arith.constant 0 : index
    %c0_7 = arith.constant 0 : index
    %8 = vector.load %arg3[%c0_6, %c0_7] : memref<64x64xf32, #tpu.memory_space<vmem>>, vector<64x64xf32>
    %cst_8 = arith.constant dense<0.000000e+00> : vector<64x128xf32>
    %9 = tpu.matmul %8, %7, %cst_8 {dimension_numbers = #tpu.dot_dimension_numbers<[1], [0], [0], [1], [0, 0, 1, 1], [], []>} : vector<64x64xf32>, vector<64x128xf32>, vector<64x128xf32> -> vector<64x128xf32>
    %c0_9 = arith.constant 0 : index
    %c1 = arith.constant 1 : index
    %10 = vector.load %arg6[%c0_9, %c1] : memref<64x3xf32, #tpu.memory_space<vmem>>, vector<64x1xf32>
    %11 = vector.broadcast %10 : vector<64x1xf32> to vector<64x128xf32>
    %12 = arith.addf %9, %11 : vector<64x128xf32>
    %cst_10 = arith.constant 0.000000e+00 : f32
    %13 = vector.broadcast %cst_10 : f32 to vector<64x128xf32>
    %14 = arith.maximumf %12, %13 : vector<64x128xf32>
    %c0_11 = arith.constant 0 : index
    %c0_12 = arith.constant 0 : index
    %15 = vector.load %arg4[%c0_11, %c0_12] : memref<64x64xf32, #tpu.memory_space<vmem>>, vector<64x64xf32>
    %cst_13 = arith.constant dense<0.000000e+00> : vector<64x128xf32>
    %16 = tpu.matmul %15, %14, %cst_13 {dimension_numbers = #tpu.dot_dimension_numbers<[1], [0], [0], [1], [0, 0, 1, 1], [], []>} : vector<64x64xf32>, vector<64x128xf32>, vector<64x128xf32> -> vector<64x128xf32>
    %c0_14 = arith.constant 0 : index
    %c2 = arith.constant 2 : index
    %17 = vector.load %arg6[%c0_14, %c2] : memref<64x3xf32, #tpu.memory_space<vmem>>, vector<64x1xf32>
    %18 = vector.broadcast %17 : vector<64x1xf32> to vector<64x128xf32>
    %19 = arith.addf %16, %18 : vector<64x128xf32>
    %cst_15 = arith.constant 0.000000e+00 : f32
    %20 = vector.broadcast %cst_15 : f32 to vector<64x128xf32>
    %21 = arith.maximumf %19, %20 : vector<64x128xf32>
    %c0_16 = arith.constant 0 : index
    %c0_17 = arith.constant 0 : index
    %22 = vector.load %arg5[%c0_16, %c0_17] : memref<8x64xf32, #tpu.memory_space<vmem>>, vector<8x64xf32>
    %cst_18 = arith.constant dense<0.000000e+00> : vector<8x128xf32>
    %23 = tpu.matmul %22, %21, %cst_18 {dimension_numbers = #tpu.dot_dimension_numbers<[1], [0], [0], [1], [0, 0, 1, 1], [], []>} : vector<8x64xf32>, vector<64x128xf32>, vector<8x128xf32> -> vector<8x128xf32>
    %c0_19 = arith.constant 0 : index
    %c0_20 = arith.constant 0 : index
    %24 = vector.load %arg7[%c0_19, %c0_20] : memref<8x1xf32, #tpu.memory_space<vmem>>, vector<8x1xf32>
    %25 = vector.broadcast %24 : vector<8x1xf32> to vector<8x128xf32>
    %26 = arith.addf %23, %25 : vector<8x128xf32>
    %c0_21 = arith.constant 0 : index
    %c0_22 = arith.constant 0 : index
    %27 = vector.load %arg8[%c0_21, %c0_22] : memref<8x128xf32, #tpu.memory_space<vmem>>, vector<8x128xf32>
    tpu.vector_store %arg8[%c0_21, %c0_22], %26 {strides = array<i32>} : memref<8x128xf32, #tpu.memory_space<vmem>>, vector<8x128xf32>,
    return
  }
  func.func @transform_0(%arg0: i32) -> (i32, i32) {
    %c0_i32 = arith.constant 0 : i32
    %c0_i32_0 = arith.constant 0 : i32
    return %c0_i32, %arg0 : i32, i32
  }
  func.func @transform_1(%arg0: i32) -> (i32, i32) {
    %c0_i32 = arith.constant 0 : i32
    %c0_i32_0 = arith.constant 0 : i32
    %c0_i32_1 = arith.constant 0 : i32
    return %c0_i32, %c0_i32_0 : i32, i32
  }
  func.func @transform_2(%arg0: i32) -> (i32, i32) {
    %c0_i32 = arith.constant 0 : i32
    %c0_i32_0 = arith.constant 0 : i32
    %c0_i32_1 = arith.constant 0 : i32
    return %c0_i32, %c0_i32_0 : i32, i32
  }
  func.func @transform_3(%arg0: i32) -> (i32, i32) {
    %c0_i32 = arith.constant 0 : i32
    %c0_i32_0 = arith.constant 0 : i32
    %c0_i32_1 = arith.constant 0 : i32
    return %c0_i32, %c0_i32_0 : i32, i32
  }
  func.func @transform_4(%arg0: i32) -> (i32, i32) {
    %c0_i32 = arith.constant 0 : i32
    %c0_i32_0 = arith.constant 0 : i32
    %c0_i32_1 = arith.constant 0 : i32
    return %c0_i32, %c0_i32_0 : i32, i32
  }
  func.func @transform_5(%arg0: i32) -> (i32, i32) {
    %c0_i32 = arith.constant 0 : i32
    %c0_i32_0 = arith.constant 0 : i32
    %c0_i32_1 = arith.constant 0 : i32
    return %c0_i32, %c0_i32_0 : i32, i32
  }
  func.func @transform_6(%arg0: i32) -> (i32, i32) {
    %c0_i32 = arith.constant 0 : i32
    %c0_i32_0 = arith.constant 0 : i32
    %c0_i32_1 = arith.constant 0 : i32
    return %c0_i32, %c0_i32_0 : i32, i32
  }
  func.func @transform_7(%arg0: i32) -> (i32, i32) {
    %c0_i32 = arith.constant 0 : i32
    %c0_i32_0 = arith.constant 0 : i32
    return %c0_i32, %arg0 : i32, i32
  }
}

</mosaic_0001>

<bundles_post_ra>
// kernel: tpu_custom_call.1
= control target key start
LH: loop header
LB: loop body
LE: loop exit
PB: predicated region body
PF: predicated region fallthrough
CT: control target
= control target key end

     0   :  { %vm85_vm0 = vcmask 130048   ;;  %v926_v4 = vmov 0   ;;  %s1161_s0 = inlined_call_operand.vmem [shape: f32[16,128], index: 0, kind: input, shape index: {}]   ;;  %s1162_s1 = inlined_call_operand.vmem [shape: f32[64,16], index: 1, kind: input, shape index: {}]   ;;  %s1163_s2 = inlined_call_operand.vmem [shape: f32[64,64], index: 2, kind: input, shape index: {}]   ;;  %s1164_s3 = inlined_call_operand.vmem [shape: f32[64,64], index: 3, kind: input, shape index: {}]   ;;  %s1165_s4 = inlined_call_operand.vmem [shape: f32[8,64], index: 4, kind: input, shape index: {}]   ;;  %s1166_s5 = inlined_call_operand.vmem [shape: f32[64,3], index: 5, kind: input, shape index: {}]   ;;  %s1167_s6 = inlined_call_operand.vmem [shape: f32[8,1], index: 6, kind: input, shape index: {}]   ;;  %s1168_s7 = inlined_call_operand.hbm [shape: f32[8,128], index: 7, kind: output, shape index: {}]  }
   0x1   :  { %v27_v0 = vld [vmem:[%s1161_s0] sm:$0xff]  ;;  %v28_v1 = vld [vmem:[%s1161_s0 + $0x8] sm:$0xff]  ;;  %895 = vset.pattern.permute.xlu0 %v926_v4  ;;  %896 = vset.pattern.permute.xlu1 %v926_v4  ;;  %v993_v6 = vld [vmem:[%s1166_s5 + $0x10] sm:$0xff] }
   0x2   :  { %v29_v2 = vld [vmem:[%s1162_s1] sm:$0xff]  ;;  %v840_v3 = vpack.c.bf16 %v28_v1, %v27_v0  ;;  %v30_v7 = vld [vmem:[%s1162_s1 + $0x8] sm:$0xff]  ;;  %v31_v8 = vld [vmem:[%s1162_s1 + $0x10] sm:$0xff]  ;;  %57 = vperm.xlu1 %896, %v993_v6  }
   0x3   :  { %753 = vmatprep.mubr.msk.f32.mxu0 %vm85_vm0, %v29_v2  ;;  %v988_v5 = vld [vmem:[%s1166_s5] sm:$0xff]  ;;  %v1006_v9 = vld [vmem:[%s1166_s5 + $0x8] sm:$0xff]  ;;  %v1011_v10 = vld [vmem:[%s1166_s5 + $0x18] sm:$0xff] }
   0x4   :  { %841 = vmatprep.subr.bf16.mxu0 %v840_v3  ;;  %47 = vperm.xlu0 %895, %v988_v5  }
   0x5   :  { %843 = vmatpush3.bf16.msra.mxu0 %v840_v3 }
   0x6   :  { %12 = vsyncpa [#allocation3], 0  ;;  %v32_v11 = vld [vmem:[%s1162_s1 + $0x18] sm:$0xff]  ;;  %v33_v12 = vld [vmem:[%s1162_s1 + $0x20] sm:$0xff]  ;;  %62 = vperm.xlu1 %896, %v1011_v10   ;;  %vm263_vm1 = vcmask 523264   ;;  %v927_v21 = vmov 1  }
   0x7   :  { %v1026_v13 = vld [vmem:[%s1166_s5 + $0x20] sm:$0xff]  ;;  %v1031_v14 = vld [vmem:[%s1166_s5 + $0x28] sm:$0xff]  ;;  %v35_v16 = vld [vmem:[%s1162_s1 + $0x30] sm:$0xff]  ;;  %v928_v2 = vmov 2   ;;  %vm930_vm2 = vmmov 0   ;;  %s932_s17 = smov [#allocation2]  }
   0x8   :  { %754 = vmatmul.mubr.msk.f32.vlgmr.msra.gmra.mrb[0].mxu0 %vm85_vm0, %v30_v7  ;;  %52 = vperm.xlu0 %895, %v1006_v9   ;;  %v34_v15 = vld [vmem:[%s1162_s1 + $0x28] sm:$0xff]  ;;  %v1046_v17 = vld [vmem:[%s1166_s5 + $0x30] sm:$0xff]  ;;  %v1051_v18 = vld [vmem:[%s1166_s5 + $0x38] sm:$0xff]  ;;  %s665_s18 = sshll.u32 %s932_s17, 4  ;;  %s666_s18 = int_to_ptr.vmem [resolvable:$true] %s665_s18 }
   0x9   :  { %756 = vmatprep.mubr.msk.f32.mxu0 %vm85_vm0, %v31_v8  ;;  %v36_v19 = vld [vmem:[%s1162_s1 + $0x38] sm:$0xff]  ;;  %v223_v20 = vld [vmem:[%s1163_s2] sm:$0xff]  ;;  %v224_v58 = vld [vmem:[%s1163_s2 + $0x8] sm:$0xff]  ;;  %s902_s19 = scalar_lea.vmem %s666_s18, 128  ;;  %p907_p1 = scmp.lt.s32.totalorder %s666_s18, %s666_s18 }
   0xa   :  { %72 = vperm.xlu1 %896, %v1031_v14   ;;  %781 = vmatprep.mubr.msk.f32.mxu1 %vm263_vm1, %v223_v20  ;;  %v225_v59 = vld [vmem:[%s1163_s2 + $0x10] sm:$0xff]  ;;  %v226_v60 = vld [vmem:[%s1163_s2 + $0x18] sm:$0xff]  ;;  %v227_v61 = vld [vmem:[%s1163_s2 + $0x20] sm:$0xff]  ;;  %p903_p0 = scmp.ne.s32.totalorder %s666_s18, %s902_s19  ;;  %p908_p2 = scmp.lt.s32.totalorder %s902_s19, %s902_s19 }
   0xb   :  { %v228_v62 = vld [vmem:[%s1163_s2 + $0x28] sm:$0xff]  ;;  %v229_v63 = vld [vmem:[%s1163_s2 + $0x30] sm:$0xff]  ;;  %v230_v0 = vld [vmem:[%s1163_s2 + $0x38] sm:$0xff] }
   0xc   :  { %757 = vmatmul.mubr.msk.f32.gmra.mrb[2].mxu0 %vm85_vm0, %v32_v11  ;;  %67 = vperm.xlu0 %895, %v1026_v13   ;;  %v401_v1 = vld [vmem:[%s1164_s3] sm:$0xff]  ;;  %p909_p3 = por %p908_p2, %p907_p1 }
   0xd   :  { %759 = vmatprep.mubr.msk.f32.mxu0 %vm85_vm0, %v33_v12 }
   0xe   :  { %82 = vperm.xlu1 %896, %v1051_v18   ;;  %p910_p4 = pnand %p909_p3, %p903_p0 }
  0x10   :  { %760 = vmatmul.mubr.msk.f32.gmra.mrb[4].mxu0 %vm85_vm0, %v34_v15  ;;  %77 = vperm.xlu0 %895, %v1046_v17  }
  0x11   :  { %762 = vmatprep.mubr.msk.f32.mxu0 %vm85_vm0, %v35_v16 }
  0x12   :  { %898 = vset.pattern.permute.xlu1 %v927_v21 }
  0x13   :  { %236 = vperm.xlu1 %898, %v1006_v9  }
  0x14   :  { %763 = vmatmul.mubr.msk.f32.gmra.mrb[6].mxu0 %vm85_vm0, %v36_v19  ;;  %897 = vset.pattern.permute.xlu0 %v927_v21 }
  0x15   :  { %232 = vperm.xlu0 %897, %v988_v5   ;;  %809 = vmatprep.mubr.msk.f32.mxu0 %vm263_vm1, %v401_v1 }
  0x17   :  { %240 = vperm.xlu1 %898, %v993_v6  }
  0x19   :  { %244 = vperm.xlu0 %897, %v1011_v10  }
  0x1b   :  { %248 = vperm.xlu1 %898, %v1026_v13  }
  0x1d   :  { %252 = vperm.xlu0 %897, %v1031_v14  }
  0x1f   :  { %256 = vperm.xlu1 %898, %v1046_v17  }
  0x21   :  { %260 = vperm.xlu0 %897, %v1051_v18  }
  0x23   :  { %899 = vset.pattern.permute.xlu1 %v928_v2 }
  0x24   :  { %410 = vperm.xlu1 %899, %v988_v5  }
  0x25   :  { %900 = vset.pattern.permute.xlu0 %v928_v2 }
  0x26   :  { %414 = vperm.xlu0 %900, %v1006_v9  }
  0x28   :  { %418 = vperm.xlu1 %899, %v993_v6  }
  0x2a   :  { %426 = vperm.xlu0 %900, %v1026_v13  }
  0x2c   :  { %422 = vperm.xlu1 %899, %v1011_v10  }
  0x2e   :  { %434 = vperm.xlu0 %900, %v1046_v17  }
  0x30   :  { %430 = vperm.xlu1 %899, %v1031_v14  }
  0x32   :  { %901 = vset.pattern.permute.xlu0 %v926_v4 }
  0x34   :  { %438 = vperm.xlu1 %899, %v1051_v18  }
  0x81   :  { %v58_v23 = vpop.permute.xlu1 %57 }
  0x83   :  { %v48_v22 = vpop.permute.xlu0 %47 }
  0x85   :  { %v63_v25 = vpop.permute.xlu1 %62 }
  0x87   :  { %v53_v24 = vpop.permute.xlu0 %52 }
  0x89   :  { %v73_v35 = vpop.permute.xlu1 %72 }
  0x8b   :  { %v68_v38 = vpop.permute.xlu0 %67 }
  0x8d   :  { %v83_v47 = vpop.permute.xlu1 %82 }
  0x8f   :  { %v78_v50 = vpop.permute.xlu0 %77 }
  0x92   :  { %v237_v7 = vpop.permute.xlu1 %236 }
  0x94   :  { %v233_v3 = vpop.permute.xlu0 %232 }
  0x96   :  { %v241_v11 = vpop.permute.xlu1 %240 }
  0x98   :  { %v245_v8 = vpop.permute.xlu0 %244 }
  0x9a   :  { %v249_v21 = vpop.permute.xlu1 %248 }
  0x9c   :  { %v253_v17 = vpop.permute.xlu0 %252 }
  0xdb   :  { %v755_v26 = vpop.f32.mrb[0].mxu0 }
  0xdc   :  { %v182_v27 = vadd.f32 %v755_v26, %v53_v24  ;;  %v176_v28 = vpop.f32.mrb[1].mxu0 }
  0xdd   :  { %v177_v29 = vadd.f32 %v176_v28, %v48_v22  ;;  %v261_v28 = vpop.permute.xlu0 %260 }
  0xde   :  { %v216_v30 = vmax.f32 %v182_v27, 0.0 }
  0xdf   :  { %v215_v31 = vmax.f32 %v177_v29, 0.0  ;;  %v758_v32 = vpop.f32.mrb[2].mxu0 }
  0xe0   :  { %v192_v33 = vadd.f32 %v758_v32, %v63_v25  ;;  %v186_v34 = vpop.f32.mrb[3].mxu0 }
  0xe1   :  { %v187_v36 = vadd.f32 %v186_v34, %v58_v23  ;;  %v844_v37 = vpack.c.bf16 %v216_v30, %v215_v31  ;;  %v257_v31 = vpop.permute.xlu1 %256 }
  0xe2   :  { %v218_v39 = vmax.f32 %v192_v33, 0.0 }
  0xe3   :  { %v217_v40 = vmax.f32 %v187_v36, 0.0  ;;  %v761_v41 = vpop.f32.mrb[4].mxu0  ;;  %845 = vmatprep.subr.bf16.mxu1 %v844_v37 }
  0xe4   :  { %v202_v42 = vadd.f32 %v761_v41, %v73_v35  ;;  %v196_v43 = vpop.f32.mrb[5].mxu0  ;;  %847 = vmatpush3.bf16.msra.mxu1 %v844_v37  ;;  %v404_v41 = vld [vmem:[%s1164_s3 + $0x18] sm:$0xff] }
  0xe5   :  { %v848_v44 = vpack.c.bf16 %v218_v39, %v217_v40  ;;  %v197_v45 = vadd.f32 %v196_v43, %v68_v38  ;;  %v402_v39 = vld [vmem:[%s1164_s3 + $0x8] sm:$0xff]  ;;  %v403_v40 = vld [vmem:[%s1164_s3 + $0x10] sm:$0xff] }
  0xe6   :  { %v220_v46 = vmax.f32 %v202_v42, 0.0  ;;  %v405_v42 = vld [vmem:[%s1164_s3 + $0x20] sm:$0xff]  ;;  %v406_v43 = vld [vmem:[%s1164_s3 + $0x28] sm:$0xff] }
  0xe7   :  { %v219_v48 = vmax.f32 %v197_v45, 0.0  ;;  %v764_v49 = vpop.f32.mrb[6].mxu0  ;;  %849 = vmatprep.subr.bf16.mxu1 %v848_v44  ;;  %v408_v45 = vld [vmem:[%s1164_s3 + $0x38] sm:$0xff] }
  0xe8   :  { %v212_v51 = vadd.f32 %v764_v49, %v83_v47  ;;  %v206_v52 = vpop.f32.mrb[7].mxu0  ;;  %851 = vmatpush3.bf16.msra.mxu1 %v848_v44  ;;  %v407_v44 = vld [vmem:[%s1164_s3 + $0x30] sm:$0xff]  ;;  %v931_v47 = vmov 0.0   ;;  %v411_v49 = vpop.permute.xlu1 %410 }
  0xe9   :  { %v852_v53 = vpack.c.bf16 %v220_v46, %v219_v48  ;;  %v207_v54 = vadd.f32 %v206_v52, %v78_v50  ;;  %v929_v46 = vmov 0.0|0.0   ;;  %v579_v48 = vld [vmem:[%s1167_s6] sm:$0xff] }
  0xea   :  { %v222_v55 = vmax.f32 %v212_v51, 0.0  ;;  %582 = vperm.xlu0 %901, %v579_v48   ;;  %v415_v51 = vpop.permute.xlu0 %414 }
  0xeb   :  { %v221_v56 = vmax.f32 %v207_v54, 0.0  ;;  %853 = vmatprep.subr.bf16.mxu1 %v852_v53 }
  0xec   :  { %855 = vmatpush3.bf16.msra.mxu1 %v852_v53  ;;  %v419_v50 = vpop.permute.xlu1 %418 }
  0xed   :  { %v856_v57 = vpack.c.bf16 %v222_v55, %v221_v56 }
  0xee   :  { %v427_v1 = vpop.permute.xlu0 %426 }
  0xef   :  { %857 = vmatprep.subr.bf16.mxu1 %v856_v57 }
  0xf0   :  { %859 = vmatpush3.bf16.msra.mxu1 %v856_v57  ;;  %v423_v52 = vpop.permute.xlu1 %422 }
  0xf1   :  { %876 = vmatprep.subr.bf16.mxu1 %v929_v46 }
  0xf3   :  { %782 = vmatmul.mubr.msk.f32.vlgmr.msra.gmra.mrb[0].mxu1 %vm263_vm1, %v224_v58 }
  0xf4   :  { %784 = vmatprep.mubr.msk.f32.mxu1 %vm263_vm1, %v225_v59 }
  0xf7   :  { %785 = vmatmul.mubr.msk.f32.gmra.mrb[2].mxu1 %vm263_vm1, %v226_v60 }
  0xf8   :  { %787 = vmatprep.mubr.msk.f32.mxu1 %vm263_vm1, %v227_v61 }
  0xfb   :  { %788 = vmatmul.mubr.msk.f32.gmra.mrb[4].mxu1 %vm263_vm1, %v228_v62  ;;  %v431_v62 = vpop.permute.xlu1 %430 }
  0xfc   :  { %790 = vmatprep.mubr.msk.f32.mxu1 %vm263_vm1, %v229_v63 }
  0xff   :  { %791 = vmatmul.mubr.msk.f32.gmra.mrb[6].mxu1 %vm263_vm1, %v230_v0 }
 0x100   :  { %837 = vmatprep.mubr.msk.f32.mxu1 %vm930_vm2, %v931_v47 }
 0x1c6   :  { %v783_v5 = vpop.f32.mrb[0].mxu1 }
 0x1c7   :  { %v360_v9 = vadd.f32 %v783_v5, %v237_v7  ;;  %v354_v12 = vpop.f32.mrb[1].mxu1 }
 0x1c8   :  { %v355_v6 = vadd.f32 %v354_v12, %v233_v3 }
 0x1c9   :  { %v394_v15 = vmax.f32 %v360_v9, 0.0 }
 0x1ca   :  { %v393_v13 = vmax.f32 %v355_v6, 0.0  ;;  %v786_v16 = vpop.f32.mrb[2].mxu1  ;;  %v439_v6 = vpop.permute.xlu1 %438 }
 0x1cb   :  { %v370_v10 = vadd.f32 %v786_v16, %v245_v8  ;;  %v364_v19 = vpop.f32.mrb[3].mxu1  ;;  %v435_v16 = vpop.permute.xlu0 %434 }
 0x1cc   :  { %v860_v20 = vpack.c.bf16 %v394_v15, %v393_v13  ;;  %v365_v14 = vadd.f32 %v364_v19, %v241_v11 }
 0x1cd   :  { %v396_v4 = vmax.f32 %v370_v10, 0.0 }
 0x1ce   :  { %v395_v22 = vmax.f32 %v365_v14, 0.0  ;;  %v789_v18 = vpop.f32.mrb[4].mxu1  ;;  %861 = vmatprep.subr.bf16.mxu0 %v860_v20 }
 0x1cf   :  { %v380_v23 = vadd.f32 %v789_v18, %v253_v17  ;;  %v374_v24 = vpop.f32.mrb[5].mxu1  ;;  %863 = vmatpush3.bf16.msra.mxu0 %v860_v20  ;;  %v583_v18 = vpop.permute.xlu0 %582 }
 0x1d0   :  { %v864_v25 = vpack.c.bf16 %v396_v4, %v395_v22  ;;  %v375_v26 = vadd.f32 %v374_v24, %v249_v21  ;;  %v578_v22 = vld [vmem:[%s1165_s4] sm:$0xff] }
 0x1d1   :  { %v398_v27 = vmax.f32 %v380_v23, 0.0 }
 0x1d2   :  { %v397_v29 = vmax.f32 %v375_v26, 0.0  ;;  %v792_v30 = vpop.f32.mrb[6].mxu1  ;;  %865 = vmatprep.subr.bf16.mxu0 %v864_v25 }
 0x1d3   :  { %v390_v32 = vadd.f32 %v792_v30, %v261_v28  ;;  %v384_v33 = vpop.f32.mrb[7].mxu1  ;;  %867 = vmatpush3.bf16.msra.mxu0 %v864_v25 }
 0x1d4   :  { %v868_v34 = vpack.c.bf16 %v398_v27, %v397_v29  ;;  %v385_v35 = vadd.f32 %v384_v33, %v257_v31 }
 0x1d5   :  { %v400_v36 = vmax.f32 %v390_v32, 0.0 }
 0x1d6   :  { %v399_v37 = vmax.f32 %v385_v35, 0.0  ;;  %869 = vmatprep.subr.bf16.mxu0 %v868_v34 }
 0x1d7   :  { %871 = vmatpush3.bf16.msra.mxu0 %v868_v34 }
 0x1d8   :  { %v872_v38 = vpack.c.bf16 %v400_v36, %v399_v37 }
 0x1da   :  { %873 = vmatprep.subr.bf16.mxu0 %v872_v38 }
 0x1db   :  { %875 = vmatpush3.bf16.msra.mxu0 %v872_v38 }
 0x1de   :  { %810 = vmatmul.mubr.msk.f32.vlgmr.msra.gmra.mrb[8].mxu0 %vm263_vm1, %v402_v39 }
 0x1df   :  { %812 = vmatprep.mubr.msk.f32.mxu0 %vm263_vm1, %v403_v40 }
 0x1e2   :  { %813 = vmatmul.mubr.msk.f32.gmra.mrb[10].mxu0 %vm263_vm1, %v404_v41 }
 0x1e3   :  { %815 = vmatprep.mubr.msk.f32.mxu0 %vm263_vm1, %v405_v42 }
 0x1e6   :  { %816 = vmatmul.mubr.msk.f32.gmra.mrb[12].mxu0 %vm263_vm1, %v406_v43 }
 0x1e7   :  { %818 = vmatprep.mubr.msk.f32.mxu0 %vm263_vm1, %v407_v44 }
 0x1ea   :  { %819 = vmatmul.mubr.msk.f32.gmra.mrb[14].mxu0 %vm263_vm1, %v408_v45 }
 0x2b1   :  { %v811_v53 = vpop.f32.mrb[8].mxu0 }
 0x2b2   :  { %v537_v54 = vadd.f32 %v811_v53, %v415_v51  ;;  %v531_v55 = vpop.f32.mrb[9].mxu0 }
 0x2b3   :  { %v532_v56 = vadd.f32 %v531_v55, %v411_v49 }
 0x2b4   :  { %v571_v57 = vmax.f32 %v537_v54, 0.0 }
 0x2b5   :  { %v570_v58 = vmax.f32 %v532_v56, 0.0  ;;  %v814_v59 = vpop.f32.mrb[10].mxu0 }
 0x2b6   :  { %v547_v60 = vadd.f32 %v814_v59, %v423_v52  ;;  %v541_v61 = vpop.f32.mrb[11].mxu0 }
 0x2b7   :  { %v877_v63 = vpack.c.bf16 %v571_v57, %v570_v58  ;;  %v542_v0 = vadd.f32 %v541_v61, %v419_v50 }
 0x2b8   :  { %v573_v2 = vmax.f32 %v547_v60, 0.0 }
 0x2b9   :  { %v572_v3 = vmax.f32 %v542_v0, 0.0  ;;  %v817_v7 = vpop.f32.mrb[12].mxu0  ;;  %878 = vmatpush3.bf16.msra.mxu1 %v877_v63 }
 0x2ba   :  { %v557_v8 = vadd.f32 %v817_v7, %v431_v62  ;;  %v551_v5 = vpop.f32.mrb[13].mxu0  ;;  %879 = vmatprep.subr.bf16.mxu1 %v929_v46 }
 0x2bb   :  { %v880_v11 = vpack.c.bf16 %v573_v2, %v572_v3  ;;  %v552_v9 = vadd.f32 %v551_v5, %v427_v1 }
 0x2bc   :  { %v575_v12 = vmax.f32 %v557_v8, 0.0 }
 0x2bd   :  { %v574_v15 = vmax.f32 %v552_v9, 0.0  ;;  %v820_v13 = vpop.f32.mrb[14].mxu0  ;;  %881 = vmatpush3.bf16.msra.mxu1 %v880_v11 }
 0x2be   :  { %v567_v10 = vadd.f32 %v820_v13, %v439_v6  ;;  %v561_v19 = vpop.f32.mrb[15].mxu0  ;;  %882 = vmatprep.subr.bf16.mxu1 %v929_v46 }
 0x2bf   :  { %v883_v17 = vpack.c.bf16 %v575_v12, %v574_v15  ;;  %v562_v20 = vadd.f32 %v561_v19, %v435_v16 }
 0x2c0   :  { %v577_v14 = vmax.f32 %v567_v10, 0.0 }
 0x2c1   :  { %v576_v21 = vmax.f32 %v562_v20, 0.0  ;;  %884 = vmatpush3.bf16.msra.mxu1 %v883_v17 }
 0x2c2   :  { %885 = vmatprep.subr.bf16.mxu1 %v929_v46 }
 0x2c3   :  { %v886_v4 = vpack.c.bf16 %v577_v14, %v576_v21 }
 0x2c5   :  { %887 = vmatpush3.bf16.msra.mxu1 %v886_v4 }
 0x2c8   :  { %838 = vmatmul.mubr.msk.f32.vlgmr.msra.gmra.mrb[8].mxu1 %vm263_vm1, %v578_v22 }
 0x39b   :  { %v654_v23 = vpop.f32.mrb[8].mxu1 }
 0x39c   :  { %v655_v24 = vadd.f32 %v654_v23, %v583_v18  ;;  %v839_v25 = vpop.f32.mrb[9].mxu1 }
 0x39e   :  { %658 = vst [vmem:[#allocation2] sm:$0xff] %v655_v24 }
 0x39f   :  { %913 = shalt.err (!%p910_p4)
}
 0x3a0   :  { %s914_s4 = scalar_lea.hbm %s1168_s7, 128 }
 0x3a1   :  { %p915_p5 = scmp.ne.s32.totalorder %s1168_s7, %s914_s4  ;;  %p918_p6 = scmp.lt.u32.totalorder %s914_s4, %s1168_s7 }
 0x3a3   :  { %p920_p7 = pnand %p918_p6, %p915_p5 }
 0x3a5   :  { %923 = shalt.err (!%p920_p7)
}
 0x3a6   :  { %668 = dma.vmem_to_hbm [thread:$0]  %s666_s18, 128, %s1168_s7, [#allocation3]  }
 0x3a7   :  { %924 = dma.done.wait [#allocation3], 128  }
 0x3a8   :  { %925 = vsyncadd [#allocation3], 4294967168 }
 0x3a9   :  { %672 = vsyncpa [#allocation3], 1 }

</bundles_post_ra>
